<compile_context>
chip_gen: v7x
topology: tpu7x:2x2x1
jax: 0.10.0
libtpu: 0.0.40
codegen_flags: <defaults>
</compile_context>

<pallas_src>
import jax
import jax.numpy as jnp
from jax.experimental import pallas as pl
from jax.experimental.pallas import tpu as pltpu

# ----------------------------- config --------------------------------------
H = W = 16            # input_size = (16, 16), input_dim = 3
P = H * W             # pixels per sample (flattened on lanes)
C_HID = 32            # hidden channels of the synthetic denoising net
T_STEPS = 1000        # T
BETA_MIN, BETA_MAX = 1e-4, 0.02
MAX_NB = 32           # max samples folded into one grid step

# Tap ordering: 3 dy-groups, and within each group dx = +1, 0, -1 so the lane-roll
# shifts (-(dy*W+dx)) mod L form an arithmetic run of stride +1 that stays inside
# [0, L) for the dy = -1 / dy = +1 groups (one strided XLU roll shifts all 3 rows).
TAP_GROUPS = (((-1, 1), (-1, 0), (-1, -1)),
              ((0, 1), (0, 0), (0, -1)),
              ((1, 1), (1, 0), (1, -1)))


# ----------------------------- kernel --------------------------------------
def _tap_shift(src3, g, L):
    """Shift row r of src3 (3, L) so it holds src[p + dy*W + dx] for tap TAP_GROUPS[g][r].

    Wrap-around across image rows / sample boundaries is handled by the hoisted
    boundary masks that the caller multiplies in afterwards."""
    if g == 0:     # dy = -1: shifts 15, 16, 17  -> one strided roll (3 rows at once)
        return pltpu.roll(src3, shift=W - 1, axis=1, stride=1, stride_axis=0)
    if g == 2:     # dy = +1: shifts L-17, L-16, L-15 -> one strided roll
        return pltpu.roll(src3, shift=L - W - 1, axis=1, stride=1, stride_axis=0)
    # dy = 0: shifts L-1, 0, 1 are not an in-range arithmetic run -> 2 single-row rolls
    return jnp.concatenate(
        [pltpu.roll(src3[0:1, :], shift=L - 1, axis=1),
         src3[1:2, :],
         pltpu.roll(src3[2:3, :], shift=1, axis=1)], axis=0)


def _ldm_kernel(data_ref, tb_ref, ind_ref, mask_ref, w1g_ref, w2g_ref, b2_ref,
                out_ref):
    # One grid step = one block of nb samples; (sample, y, x) folded onto lanes.
    L = data_ref.shape[-1]

    # --- DDPM forward noising q(x_t | x_0) ----------------------------------
    # data rows: [x, eps, sqrt(alpha_bar[t]), sqrt(1-alpha_bar[t])] (scales pre-expanded)
    d = data_ref[0]                                   # (4, L) f32
    prod = d[0:2, :] * d[2:4, :]                      # [s0*x, s1*eps]
    xt = prod[0:1, :] + prod[1:2, :]                  # (1, L) noised sample x_t

    # --- conv1: 3x3, 1 -> C_HID, + time-embedding bias, SiLU ------------------
    # time-bias (+conv1 bias, folded in wrapper) via one bf16 MXU matmul on the
    # hoisted one-hot sample matrix; accumulate the pre-activation in f32.
    pre = jnp.dot(tb_ref[0], ind_ref[...],
                  preferred_element_type=jnp.float32)            # (C, L)

    xt3 = jnp.broadcast_to(xt, (3, L))
    for g in range(3):
        taps = _tap_shift(xt3, g, L) * mask_ref[g]               # (3, L) f32, masked
        pre = pre + jnp.dot(w1g_ref[g], taps.astype(jnp.bfloat16),
                            preferred_element_type=jnp.float32)

    # SiLU via tanh on the EUP: sigmoid(x) = 0.5*tanh(0.5*x) + 0.5
    h = pre * (0.5 * jnp.tanh(0.5 * pre) + 0.5)                  # (C, L) f32
    hb = h.astype(jnp.bfloat16)

    # --- conv2: 3x3, C_HID -> 1 ------------------------------------------------
    # channel contraction per dy-group on the MXU, then the spatial gather with the
    # same grouped shifts/masks; accumulate a dense (3, L) block and reduce once.
    acc3 = jnp.zeros((3, L), jnp.float32)
    for g in range(3):
        gm = jnp.dot(w2g_ref[g], hb, preferred_element_type=jnp.float32)   # (3, L)
        acc3 = acc3 + _tap_shift(gm, g, L) * mask_ref[g]
    out_ref[0] = b2_ref[0, 0] + jnp.sum(acc3, axis=0, keepdims=True)       # (1, L)


# ----------------------------- glue -----------------------------------------
def init_params(key):
    ks = jax.random.split(key, 3)
    # conv1 weight grouped (3 dy-groups, C_out, 3 dx-taps); conv2 grouped (3, 3, C_in).
    w1g = jax.random.normal(ks[0], (3, C_HID, 3), jnp.float32) / 3.0
    w2g = jax.random.normal(ks[1], (3, 3, C_HID), jnp.float32) / jnp.sqrt(9.0 * C_HID)
    b1 = jnp.zeros((C_HID,), jnp.float32)
    b2 = jnp.zeros((1, 1), jnp.float32)
    wt = jax.random.normal(ks[2], (C_HID, C_HID), jnp.float32) / jnp.sqrt(float(C_HID))
    bt = jnp.zeros((C_HID,), jnp.float32)
    return dict(w1g=w1g, w2g=w2g, b1=b1, b2=b2, wt=wt, bt=bt)


def _time_bias(t, wt, bt):
    # sinusoidal timestep embedding -> SiLU -> linear  (tiny (N,C) math, stays in JAX glue)
    half = C_HID // 2
    freqs = jnp.exp(-jnp.log(10000.0) * jnp.arange(half, dtype=jnp.float32) / half)
    args = t.astype(jnp.float32)[:, None] * freqs[None, :]
    temb = jnp.concatenate([jnp.sin(args), jnp.cos(args)], axis=-1)   # (N, C)
    temb = temb * jax.nn.sigmoid(temb)
    return temb @ wt + bt                                             # (N, C)


def latent_diffusion_forward(params, x, key):
    """x: (N, H, W) float32 (input_dim == 3, no first-stage model)."""
    N = x.shape[0]
    k_t, k_eps = jax.random.split(key)
    t = jax.random.randint(k_t, (N,), 0, T_STEPS)                     # torch.randint
    epsilon = jax.random.normal(k_eps, (N, 1, H, W), jnp.float32)     # torch.randn (NCHW)

    # DDPM schedule (DDPMScheduler.make_noisy coefficients)
    betas = jnp.linspace(BETA_MIN, BETA_MAX, T_STEPS, dtype=jnp.float32)
    alpha_bar = jnp.cumprod(1.0 - betas)
    ab = alpha_bar[t]
    s0 = jnp.sqrt(ab)
    s1 = jnp.sqrt(1.0 - ab)

    # time-embedding bias (+ conv1 bias folded in so the kernel has no separate b1 add)
    tbias = _time_bias(t, params["wt"], params["bt"]) + params["b1"][None, :]   # (N, C)

    # ---- batch blocking: nb samples per grid step, flattened onto lanes ----
    # nb = cdiv(N, 2) (capped) so N >= 4 always yields >= 2 parallel blocks (v7x: 2 TCs).
    nb = min(MAX_NB, max(2, -(-N // 2)))
    n_blocks = -(-N // nb)
    n_pad = n_blocks * nb
    pad = n_pad - N

    x_flat = x.reshape(N, P)
    e_flat = epsilon.reshape(N, P)
    s0_full = jnp.broadcast_to(s0[:, None], (N, P))
    s1_full = jnp.broadcast_to(s1[:, None], (N, P))
    if pad:
        # zero padding => padded samples produce finite garbage that is sliced off below
        x_flat = jnp.pad(x_flat, ((0, pad), (0, 0)))
        e_flat = jnp.pad(e_flat, ((0, pad), (0, 0)))
        s0_full = jnp.pad(s0_full, ((0, pad), (0, 0)))
        s1_full = jnp.pad(s1_full, ((0, pad), (0, 0)))
        tbias = jnp.pad(tbias, ((0, pad), (0, 0)))

    L = nb * P
    # coalesced per-block data: rows [x, eps, s0, s1], lane g = sample*P + pixel
    data = jnp.stack([x_flat, e_flat, s0_full, s1_full], axis=1)          # (n_pad, 4, P)
    data = data.reshape(n_blocks, nb, 4, P).transpose(0, 2, 1, 3).reshape(n_blocks, 4, L)
    tb_in = tbias.reshape(n_blocks, nb, C_HID).transpose(0, 2, 1).astype(jnp.bfloat16)

    # ---- grid-invariant constants, hoisted (DMA'd once, resident in VMEM) ----
    ind = (jnp.arange(L, dtype=jnp.int32)[None, :] // P
           == jnp.arange(nb, dtype=jnp.int32)[:, None]).astype(jnp.bfloat16)   # (nb, L)
    lane = jnp.arange(L, dtype=jnp.int32)
    col = lane % W
    row = (lane // W) % H
    masks = jnp.stack([
        jnp.stack([((row + dy >= 0) & (row + dy < H) &
                    (col + dx >= 0) & (col + dx < W)).astype(jnp.float32)
                   for (dy, dx) in grp], axis=0)
        for grp in TAP_GROUPS], axis=0)                                         # (3, 3, L)

    w1g = params["w1g"].astype(jnp.bfloat16)
    w2g = params["w2g"].astype(jnp.bfloat16)

    pred = pl.pallas_call(
        _ldm_kernel,
        out_shape=jax.ShapeDtypeStruct((n_blocks, 1, L), jnp.float32),
        grid=(n_blocks,),
        in_specs=[
            pl.BlockSpec((1, 4, L), lambda b: (b, 0, 0)),          # x/eps/s0/s1 (coalesced)
            pl.BlockSpec((1, C_HID, nb), lambda b: (b, 0, 0)),     # time bias (+b1), bf16
            pl.BlockSpec((nb, L), lambda b: (0, 0)),               # one-hot ind (resident)
            pl.BlockSpec((3, 3, L), lambda b: (0, 0, 0)),          # boundary masks (resident)
            pl.BlockSpec((3, C_HID, 3), lambda b: (0, 0, 0)),      # conv1 weight (grouped)
            pl.BlockSpec((3, 3, C_HID), lambda b: (0, 0, 0)),      # conv2 weight (grouped)
            pl.BlockSpec(memory_space=pltpu.MemorySpace.SMEM),     # conv2 bias (1,1)
        ],
        out_specs=pl.BlockSpec((1, 1, L), lambda b: (b, 0, 0)),
        compiler_params=pltpu.CompilerParams(
            dimension_semantics=("parallel",)),    # blocks independent (v7x: 2 TCs)
    )(data, tb_in, ind, masks, w1g, w2g, params["b2"])

    epsilon_pred = pred.reshape(n_pad, P)[:N].reshape(N, 1, H, W)       # back to NCHW
    return epsilon_pred, epsilon, t


# ----------------------------- main ------------------------------------------
if __name__ == "__main__":
    key = jax.random.PRNGKey(0)
    k_param, k_x, k_fwd = jax.random.split(key, 3)
    params = init_params(k_param)

    N = 2
    x = jax.random.normal(k_x, (N, H, W), jnp.float32)

    eps_pred, epsilon, t = jax.jit(latent_diffusion_forward)(params, x, k_fwd)
    jax.block_until_ready((eps_pred, epsilon, t))

    assert eps_pred.shape == (N, 1, H, W)
    assert epsilon.shape == (N, 1, H, W)
    assert t.shape == (N,)
    assert bool(jnp.all(jnp.isfinite(eps_pred)))
    print("KERNEL_OK")
</pallas_src>

<mosaic_0001>
module attributes {stable_mosaic.version = 11 : i64} {
  func.func @_ldm_kernel(%arg0: i32, %arg1: memref<1x4x512xf32, #tpu.memory_space<vmem>>, %arg2: memref<1x32x2xbf16, #tpu.memory_space<vmem>>, %arg3: memref<2x512xbf16, #tpu.memory_space<vmem>>, %arg4: memref<3x3x512xf32, #tpu.memory_space<vmem>>, %arg5: memref<3x32x3xbf16, #tpu.memory_space<vmem>>, %arg6: memref<3x3x32xbf16, #tpu.memory_space<vmem>>, %arg7: memref<1x1xf32, #tpu.memory_space<smem>>, %arg8: memref<1x1x512xf32, #tpu.memory_space<vmem>>) attributes {dimension_semantics = [#tpu.dimension_semantics<parallel>], iteration_bounds = array<i64: 1>, scalar_prefetch = 0 : i64, scratch_operands = 0 : i64, tpu.core_type = #tpu.core_type<tc>, window_params = [{transform_indices = @transform_0, window_bounds = array<i64: 1, 4, 512>}, {transform_indices = @transform_1, window_bounds = array<i64: 1, 32, 2>}, {pipeline_mode = #tpu.pipeline_mode<synchronous>, transform_indices = @transform_2, window_bounds = array<i64: 2, 512>}, {pipeline_mode = #tpu.pipeline_mode<synchronous>, transform_indices = @transform_3, window_bounds = array<i64: 3, 3, 512>}, {pipeline_mode = #tpu.pipeline_mode<synchronous>, transform_indices = @transform_4, window_bounds = array<i64: 3, 32, 3>}, {pipeline_mode = #tpu.pipeline_mode<synchronous>, transform_indices = @transform_5, window_bounds = array<i64: 3, 3, 32>}, {transform_indices = @transform_6, window_bounds = array<i64: 1, 1>}, {transform_indices = @transform_7, window_bounds = array<i64: 1, 1, 512>}]} {
    %c0 = arith.constant 0 : index
    %c0_0 = arith.constant 0 : index
    %c0_1 = arith.constant 0 : index
    %0 = vector.load %arg1[%c0, %c0_0, %c0_1] : memref<1x4x512xf32, #tpu.memory_space<vmem>>, vector<1x4x512xf32>
    %1 = vector.shape_cast %0 : vector<1x4x512xf32> to vector<4x512xf32>
    %2 = vector.extract_strided_slice %1 {offsets = [0, 0], sizes = [2, 512], strides = [1, 1]} : vector<4x512xf32> to vector<2x512xf32>
    %3 = vector.extract_strided_slice %1 {offsets = [2, 0], sizes = [2, 512], strides = [1, 1]} : vector<4x512xf32> to vector<2x512xf32>
    %4 = arith.mulf %2, %3 : vector<2x512xf32>
    %5 = vector.extract_strided_slice %4 {offsets = [0, 0], sizes = [1, 512], strides = [1, 1]} : vector<2x512xf32> to vector<1x512xf32>
    %6 = vector.extract_strided_slice %4 {offsets = [1, 0], sizes = [1, 512], strides = [1, 1]} : vector<2x512xf32> to vector<1x512xf32>
    %7 = arith.addf %5, %6 : vector<1x512xf32>
    %c0_2 = arith.constant 0 : index
    %c0_3 = arith.constant 0 : index
    %c0_4 = arith.constant 0 : index
    %8 = vector.load %arg2[%c0_2, %c0_3, %c0_4] : memref<1x32x2xbf16, #tpu.memory_space<vmem>>, vector<1x32x2xbf16>
    %9 = vector.shape_cast %8 : vector<1x32x2xbf16> to vector<32x2xbf16>
    %c0_5 = arith.constant 0 : index
    %c0_6 = arith.constant 0 : index
    %10 = vector.load %arg3[%c0_5, %c0_6] : memref<2x512xbf16, #tpu.memory_space<vmem>>, vector<2x512xbf16>
    %cst = arith.constant dense<0.000000e+00> : vector<32x512xf32>
    %11 = tpu.matmul %9, %10, %cst {dimension_numbers = #tpu.dot_dimension_numbers<[1], [0], [0], [1], [0, 0, 1, 1], [], []>} : vector<32x2xbf16>, vector<2x512xbf16>, vector<32x512xf32> -> vector<32x512xf32>
    %12 = vector.shape_cast %7 : vector<1x512xf32> to vector<1x512xf32>
    %13 = vector.broadcast %12 : vector<1x512xf32> to vector<3x512xf32>
    %c15_i32 = arith.constant 15 : i32
    %14 = tpu.dynamic_rotate %13 by %c15_i32 dim 1 {stride = 1 : si32, stride_dimension = 0 : si32} : vector<3x512xf32>, i32 -> vector<3x512xf32>
    %c0_7 = arith.constant 0 : index
    %c0_8 = arith.constant 0 : index
    %c0_9 = arith.constant 0 : index
    %15 = vector.load %arg4[%c0_7, %c0_8, %c0_9] : memref<3x3x512xf32, #tpu.memory_space<vmem>>, vector<1x3x512xf32>
    %16 = vector.shape_cast %15 : vector<1x3x512xf32> to vector<3x512xf32>
    %17 = arith.mulf %14, %16 : vector<3x512xf32>
    %c0_10 = arith.constant 0 : index
    %c0_11 = arith.constant 0 : index
    %c0_12 = arith.constant 0 : index
    %18 = vector.load %arg5[%c0_10, %c0_11, %c0_12] : memref<3x32x3xbf16, #tpu.memory_space<vmem>>, vector<1x32x3xbf16>
    %19 = vector.shape_cast %18 : vector<1x32x3xbf16> to vector<32x3xbf16>
    %20 = arith.truncf %17 : vector<3x512xf32> to vector<3x512xbf16>
    %cst_13 = arith.constant dense<0.000000e+00> : vector<32x512xf32>
    %21 = tpu.matmul %19, %20, %cst_13 {dimension_numbers = #tpu.dot_dimension_numbers<[1], [0], [0], [1], [0, 0, 1, 1], [], []>} : vector<32x3xbf16>, vector<3x512xbf16>, vector<32x512xf32> -> vector<32x512xf32>
    %22 = arith.addf %11, %21 : vector<32x512xf32>
    %23 = vector.extract_strided_slice %13 {offsets = [0, 0], sizes = [1, 512], strides = [1, 1]} : vector<3x512xf32> to vector<1x512xf32>
    %c511_i32 = arith.constant 511 : i32
    %24 = tpu.dynamic_rotate %23 by %c511_i32 dim 1 : vector<1x512xf32>, i32 -> vector<1x512xf32>
    %25 = vector.extract_strided_slice %13 {offsets = [1, 0], sizes = [1, 512], strides = [1, 1]} : vector<3x512xf32> to vector<1x512xf32>
    %26 = vector.extract_strided_slice %13 {offsets = [2, 0], sizes = [1, 512], strides = [1, 1]} : vector<3x512xf32> to vector<1x512xf32>
    %c1_i32 = arith.constant 1 : i32
    %27 = tpu.dynamic_rotate %26 by %c1_i32 dim 1 : vector<1x512xf32>, i32 -> vector<1x512xf32>
    %28 = tpu.concatenate %24, %25, %27 in 0 : vector<1x512xf32>, vector<1x512xf32>, vector<1x512xf32> -> vector<3x512xf32>
    %c1 = arith.constant 1 : index
    %c0_14 = arith.constant 0 : index
    %c0_15 = arith.constant 0 : index
    %29 = vector.load %arg4[%c1, %c0_14, %c0_15] : memref<3x3x512xf32, #tpu.memory_space<vmem>>, vector<1x3x512xf32>
    %30 = vector.shape_cast %29 : vector<1x3x512xf32> to vector<3x512xf32>
    %31 = arith.mulf %28, %30 : vector<3x512xf32>
    %c1_16 = arith.constant 1 : index
    %c0_17 = arith.constant 0 : index
    %c0_18 = arith.constant 0 : index
    %32 = vector.load %arg5[%c1_16, %c0_17, %c0_18] : memref<3x32x3xbf16, #tpu.memory_space<vmem>>, vector<1x32x3xbf16>
    %33 = vector.shape_cast %32 : vector<1x32x3xbf16> to vector<32x3xbf16>
    %34 = arith.truncf %31 : vector<3x512xf32> to vector<3x512xbf16>
    %cst_19 = arith.constant dense<0.000000e+00> : vector<32x512xf32>
    %35 = tpu.matmul %33, %34, %cst_19 {dimension_numbers = #tpu.dot_dimension_numbers<[1], [0], [0], [1], [0, 0, 1, 1], [], []>} : vector<32x3xbf16>, vector<3x512xbf16>, vector<32x512xf32> -> vector<32x512xf32>
    %36 = arith.addf %22, %35 : vector<32x512xf32>
    %c495_i32 = arith.constant 495 : i32
    %37 = tpu.dynamic_rotate %13 by %c495_i32 dim 1 {stride = 1 : si32, stride_dimension = 0 : si32} : vector<3x512xf32>, i32 -> vector<3x512xf32>
    %c2 = arith.constant 2 : index
    %c0_20 = arith.constant 0 : index
    %c0_21 = arith.constant 0 : index
    %38 = vector.load %arg4[%c2, %c0_20, %c0_21] : memref<3x3x512xf32, #tpu.memory_space<vmem>>, vector<1x3x512xf32>
    %39 = vector.shape_cast %38 : vector<1x3x512xf32> to vector<3x512xf32>
    %40 = arith.mulf %37, %39 : vector<3x512xf32>
    %c2_22 = arith.constant 2 : index
    %c0_23 = arith.constant 0 : index
    %c0_24 = arith.constant 0 : index
    %41 = vector.load %arg5[%c2_22, %c0_23, %c0_24] : memref<3x32x3xbf16, #tpu.memory_space<vmem>>, vector<1x32x3xbf16>
    %42 = vector.shape_cast %41 : vector<1x32x3xbf16> to vector<32x3xbf16>
    %43 = arith.truncf %40 : vector<3x512xf32> to vector<3x512xbf16>
    %cst_25 = arith.constant dense<0.000000e+00> : vector<32x512xf32>
    %44 = tpu.matmul %42, %43, %cst_25 {dimension_numbers = #tpu.dot_dimension_numbers<[1], [0], [0], [1], [0, 0, 1, 1], [], []>} : vector<32x3xbf16>, vector<3x512xbf16>, vector<32x512xf32> -> vector<32x512xf32>
    %45 = arith.addf %36, %44 : vector<32x512xf32>
    %cst_26 = arith.constant 5.000000e-01 : f32
    %46 = vector.broadcast %cst_26 : f32 to vector<32x512xf32>
    %47 = arith.mulf %46, %45 : vector<32x512xf32>
    %48 = math.tanh %47 : vector<32x512xf32>
    %cst_27 = arith.constant 5.000000e-01 : f32
    %49 = vector.broadcast %cst_27 : f32 to vector<32x512xf32>
    %50 = arith.mulf %49, %48 : vector<32x512xf32>
    %cst_28 = arith.constant 5.000000e-01 : f32
    %51 = vector.broadcast %cst_28 : f32 to vector<32x512xf32>
    %52 = arith.addf %50, %51 : vector<32x512xf32>
    %53 = arith.mulf %45, %52 : vector<32x512xf32>
    %54 = arith.truncf %53 : vector<32x512xf32> to vector<32x512xbf16>
    %cst_29 = arith.constant 0.000000e+00 : f32
    %55 = vector.broadcast %cst_29 : f32 to vector<3x512xf32>
    %c0_30 = arith.constant 0 : index
    %c0_31 = arith.constant 0 : index
    %c0_32 = arith.constant 0 : index
    %56 = vector.load %arg6[%c0_30, %c0_31, %c0_32] : memref<3x3x32xbf16, #tpu.memory_space<vmem>>, vector<1x3x32xbf16>
    %57 = vector.shape_cast %56 : vector<1x3x32xbf16> to vector<3x32xbf16>
    %cst_33 = arith.constant dense<0.000000e+00> : vector<3x512xf32>
    %58 = tpu.matmul %57, %54, %cst_33 {dimension_numbers = #tpu.dot_dimension_numbers<[1], [0], [0], [1], [0, 0, 1, 1], [], []>} : vector<3x32xbf16>, vector<32x512xbf16>, vector<3x512xf32> -> vector<3x512xf32>
    %c15_i32_34 = arith.constant 15 : i32
    %59 = tpu.dynamic_rotate %58 by %c15_i32_34 dim 1 {stride = 1 : si32, stride_dimension = 0 : si32} : vector<3x512xf32>, i32 -> vector<3x512xf32>
    %c0_35 = arith.constant 0 : index
    %c0_36 = arith.constant 0 : index
    %c0_37 = arith.constant 0 : index
    %60 = vector.load %arg4[%c0_35, %c0_36, %c0_37] : memref<3x3x512xf32, #tpu.memory_space<vmem>>, vector<1x3x512xf32>
    %61 = vector.shape_cast %60 : vector<1x3x512xf32> to vector<3x512xf32>
    %62 = arith.mulf %59, %61 : vector<3x512xf32>
    %63 = arith.addf %55, %62 : vector<3x512xf32>
    %c1_38 = arith.constant 1 : index
    %c0_39 = arith.constant 0 : index
    %c0_40 = arith.constant 0 : index
    %64 = vector.load %arg6[%c1_38, %c0_39, %c0_40] : memref<3x3x32xbf16, #tpu.memory_space<vmem>>, vector<1x3x32xbf16>
    %65 = vector.shape_cast %64 : vector<1x3x32xbf16> to vector<3x32xbf16>
    %cst_41 = arith.constant dense<0.000000e+00> : vector<3x512xf32>
    %66 = tpu.matmul %65, %54, %cst_41 {dimension_numbers = #tpu.dot_dimension_numbers<[1], [0], [0], [1], [0, 0, 1, 1], [], []>} : vector<3x32xbf16>, vector<32x512xbf16>, vector<3x512xf32> -> vector<3x512xf32>
    %67 = vector.extract_strided_slice %66 {offsets = [0, 0], sizes = [1, 512], strides = [1, 1]} : vector<3x512xf32> to vector<1x512xf32>
    %c511_i32_42 = arith.constant 511 : i32
    %68 = tpu.dynamic_rotate %67 by %c511_i32_42 dim 1 : vector<1x512xf32>, i32 -> vector<1x512xf32>
    %69 = vector.extract_strided_slice %66 {offsets = [1, 0], sizes = [1, 512], strides = [1, 1]} : vector<3x512xf32> to vector<1x512xf32>
    %70 = vector.extract_strided_slice %66 {offsets = [2, 0], sizes = [1, 512], strides = [1, 1]} : vector<3x512xf32> to vector<1x512xf32>
    %c1_i32_43 = arith.constant 1 : i32
    %71 = tpu.dynamic_rotate %70 by %c1_i32_43 dim 1 : vector<1x512xf32>, i32 -> vector<1x512xf32>
    %72 = tpu.concatenate %68, %69, %71 in 0 : vector<1x512xf32>, vector<1x512xf32>, vector<1x512xf32> -> vector<3x512xf32>
    %c1_44 = arith.constant 1 : index
    %c0_45 = arith.constant 0 : index
    %c0_46 = arith.constant 0 : index
    %73 = vector.load %arg4[%c1_44, %c0_45, %c0_46] : memref<3x3x512xf32, #tpu.memory_space<vmem>>, vector<1x3x512xf32>
    %74 = vector.shape_cast %73 : vector<1x3x512xf32> to vector<3x512xf32>
    %75 = arith.mulf %72, %74 : vector<3x512xf32>
    %76 = arith.addf %63, %75 : vector<3x512xf32>
    %c2_47 = arith.constant 2 : index
    %c0_48 = arith.constant 0 : index
    %c0_49 = arith.constant 0 : index
    %77 = vector.load %arg6[%c2_47, %c0_48, %c0_49] : memref<3x3x32xbf16, #tpu.memory_space<vmem>>, vector<1x3x32xbf16>
    %78 = vector.shape_cast %77 : vector<1x3x32xbf16> to vector<3x32xbf16>
    %cst_50 = arith.constant dense<0.000000e+00> : vector<3x512xf32>
    %79 = tpu.matmul %78, %54, %cst_50 {dimension_numbers = #tpu.dot_dimension_numbers<[1], [0], [0], [1], [0, 0, 1, 1], [], []>} : vector<3x32xbf16>, vector<32x512xbf16>, vector<3x512xf32> -> vector<3x512xf32>
    %c495_i32_51 = arith.constant 495 : i32
    %80 = tpu.dynamic_rotate %79 by %c495_i32_51 dim 1 {stride = 1 : si32, stride_dimension = 0 : si32} : vector<3x512xf32>, i32 -> vector<3x512xf32>
    %c2_52 = arith.constant 2 : index
    %c0_53 = arith.constant 0 : index
    %c0_54 = arith.constant 0 : index
    %81 = vector.load %arg4[%c2_52, %c0_53, %c0_54] : memref<3x3x512xf32, #tpu.memory_space<vmem>>, vector<1x3x512xf32>
    %82 = vector.shape_cast %81 : vector<1x3x512xf32> to vector<3x512xf32>
    %83 = arith.mulf %80, %82 : vector<3x512xf32>
    %84 = arith.addf %76, %83 : vector<3x512xf32>
    %c0_55 = arith.constant 0 : index
    %c0_56 = arith.constant 0 : index
    %85 = memref.load %arg7[%c0_55, %c0_56] : memref<1x1xf32, #tpu.memory_space<smem>>
    %cst_57 = arith.constant dense<0.000000e+00> : vector<512xf32>
    %86 = vector.multi_reduction <add>, %84, %cst_57 [0] : vector<3x512xf32> to vector<512xf32>
    %87 = vector.shape_cast %86 : vector<512xf32> to vector<1x512xf32>
    %88 = vector.broadcast %85 : f32 to vector<1x512xf32>
    %89 = arith.addf %88, %87 : vector<1x512xf32>
    %c0_58 = arith.constant 0 : index
    %c0_59 = arith.constant 0 : index
    %c0_60 = arith.constant 0 : index
    %90 = vector.load %arg8[%c0_58, %c0_59, %c0_60] : memref<1x1x512xf32, #tpu.memory_space<vmem>>, vector<1x1x512xf32>
    %91 = vector.shape_cast %90 : vector<1x1x512xf32> to vector<1x512xf32>
    %92 = vector.shape_cast %89 : vector<1x512xf32> to vector<1x1x512xf32>
    tpu.vector_store %arg8[%c0_58, %c0_59, %c0_60], %92 {strides = array<i32>} : memref<1x1x512xf32, #tpu.memory_space<vmem>>, vector<1x1x512xf32>,
    return
  }
  func.func @transform_0(%arg0: i32) -> (i32, i32, i32) {
    %c0_i32 = arith.constant 0 : i32
    %c0_i32_0 = arith.constant 0 : i32
    %c0_i32_1 = arith.constant 0 : i32
    return %arg0, %c0_i32, %c0_i32_0 : i32, i32, i32
  }
  func.func @transform_1(%arg0: i32) -> (i32, i32, i32) {
    %c0_i32 = arith.constant 0 : i32
    %c0_i32_0 = arith.constant 0 : i32
    %c0_i32_1 = arith.constant 0 : i32
    return %arg0, %c0_i32, %c0_i32_0 : i32, i32, i32
  }
  func.func @transform_2(%arg0: i32) -> (i32, i32) {
    %c0_i32 = arith.constant 0 : i32
    %c0_i32_0 = arith.constant 0 : i32
    %c0_i32_1 = arith.constant 0 : i32
    return %c0_i32, %c0_i32_0 : i32, i32
  }
  func.func @transform_3(%arg0: i32) -> (i32, i32, i32) {
    %c0_i32 = arith.constant 0 : i32
    %c0_i32_0 = arith.constant 0 : i32
    %c0_i32_1 = arith.constant 0 : i32
    %c0_i32_2 = arith.constant 0 : i32
    return %c0_i32, %c0_i32_0, %c0_i32_1 : i32, i32, i32
  }
  func.func @transform_4(%arg0: i32) -> (i32, i32, i32) {
    %c0_i32 = arith.constant 0 : i32
    %c0_i32_0 = arith.constant 0 : i32
    %c0_i32_1 = arith.constant 0 : i32
    %c0_i32_2 = arith.constant 0 : i32
    return %c0_i32, %c0_i32_0, %c0_i32_1 : i32, i32, i32
  }
  func.func @transform_5(%arg0: i32) -> (i32, i32, i32) {
    %c0_i32 = arith.constant 0 : i32
    %c0_i32_0 = arith.constant 0 : i32
    %c0_i32_1 = arith.constant 0 : i32
    %c0_i32_2 = arith.constant 0 : i32
    return %c0_i32, %c0_i32_0, %c0_i32_1 : i32, i32, i32
  }
  func.func @transform_6(%arg0: i32) -> (i32, i32) {
    %c0_i32 = arith.constant 0 : i32
    %c0_i32_0 = arith.constant 0 : i32
    %c0_i32_1 = arith.constant 0 : i32
    return %c0_i32, %c0_i32_0 : i32, i32
  }
  func.func @transform_7(%arg0: i32) -> (i32, i32, i32) {
    %c0_i32 = arith.constant 0 : i32
    %c0_i32_0 = arith.constant 0 : i32
    %c0_i32_1 = arith.constant 0 : i32
    return %arg0, %c0_i32, %c0_i32_0 : i32, i32, i32
  }
}

</mosaic_0001>

<bundles_post_ra>
// kernel: latent_diffusion_forward.21
= control target key start
LH: loop header
LB: loop body
LE: loop exit
PB: predicated region body
PF: predicated region fallthrough
CT: control target
= control target key end

     0   :  { %v57_v0 = vlaneseq  ;;  %v1545_v22 = vmov 0   ;;  %s1546_s28 = smov 1   ;;  %s1547_s29 = smov 127   ;;  %v1549_v23 = vmov 1966171168   ;;  %vm156_vm0 = vcmask 1040384   ;;  %s2021_s0 = inlined_call_operand.vmem [shape: f32[1,4,512], index: 0, kind: input, shape index: {}]   ;;  %s2022_s4 = inlined_call_operand.vmem [shape: bf16[3,32,3], index: 4, kind: input, shape index: {}]   ;;  %s2023_s1 = inlined_call_operand.vmem [shape: bf16[1,32,2], index: 1, kind: input, shape index: {}]   ;;  %s2024_s2 = inlined_call_operand.vmem [shape: bf16[2,512], index: 2, kind: input, shape index: {}]   ;;  %s2025_s3 = inlined_call_operand.vmem [shape: f32[3,3,512], index: 3, kind: input, shape index: {}]   ;;  %s2026_s5 = inlined_call_operand.vmem [shape: bf16[3,3,32], index: 5, kind: input, shape index: {}]   ;;  %s2027_s6 = inlined_call_operand.<no memory space> [shape: f32[1,1], index: 6, kind: input, shape index: {}]   ;;  %s2028_s7 = inlined_call_operand.vmem [shape: f32[1,1,512], index: 7, kind: output, shape index: {}]  }
   0x1   :  { %v29_v1 = vld [vmem:[%s2021_s0 + $0x8] sm:$0xff]  ;;  %v28_v2 = vld [vmem:[%s2021_s0] sm:$0xff]  ;;  %s1544_s0 = smov 271   ;;  %204 = vmatprep.mubr.bf16.mxu0 %v1545_v22  ;;  %257 = vmatprep.mubr.bf16.mxu1 %v1545_v22  ;;  %s1548_s30 = smov 367   ;;  %v298_v24 = vunpack.c.l.s4 %v1549_v23  ;;  %vm157_vm2 = vcmask 1041408   ;;  %v1550_v40 = vmov 65535  }
   0x2   :  { %v1393_v3 = vrot.slane %v29_v1, 10  ;;  %v1598_v4 = vshrl.u32 %v57_v0, 7  ;;  %v1392_v5 = vrot.slane %v28_v2, 10  ;;  %v1645_v28 = vand.u32 127, %v57_v0  ;;  %v1650_v29 = vld [vmem:[%s2025_s3] sm:$0x77] }
   0x3   :  { %v299_v25 = vunpack.c.0.s8 %v298_v24  ;;  %v1404_v26 = vld.sshfl [vmem:[%s2024_s2] sm:$0x33 pattern:$0x75316420]  ;;  %v1655_v30 = vld [vmem:[%s2025_s3 + $0x8] sm:$0x77]  ;;  %v1671_v37 = vcombine.high %v1650_v29, %v1650_v29 }
   0x4   :  { %v39_v6 = vmul.f32 %v1393_v3, %v29_v1  ;;  %v38_v7 = vmul.f32 %v1392_v5, %v28_v2  ;;  %v59_v9 = vsub.s32 0, %v1598_v4  ;;  %v63_v11 = vsub.s32 4, %v1598_v4  ;;  %v1500_v5 = vld [vmem:[%s2022_s4] sm:$0xff]  }
   0x5   :  { %v111_v27 = vadd.s32 15, %v1598_v4  ;;  %v296_v33 = vcombine.high %v1404_v26, %v1404_v26  ;;  %v1658_v34 = vsub.s32 %v299_v25, %v1598_v4  ;;  %v1667_v36 = vcombine.high %v1655_v30, %v1655_v30 }
   0x6   :  { %v1395_v8 = vrot.slane %v39_v6, 9  ;;  %v1394_v10 = vrot.slane %v38_v7, 9  ;;  %v158_v41 = vsel %vm156_vm0, 4294967295, %v1550_v40  ;;  %vm459_vm3 = vcmp.lt.s32.totalorder %v1645_v28, 1 }
   0x7   :  { %vm1661_vm1 = vcmp.lt.s32.totalorder %v1645_v28, %v111_v27  ;;  %v310_v42 = vrot.slane %v296_v33, %v1658_v34  ;;  %v1688_v51 = vsel %vm157_vm2, %v158_v41, 0  ;;  %v303_v52 = vrot.slane %v1404_v26, %v1658_v34  ;;  %v1501_v33 = vld [vmem:[%s2022_s4 + $0x8] sm:$0xff]  }
   0x8   :  { %v49_v12 = vadd.f32 %v1395_v8, %v39_v6  ;;  %v48_v13 = vadd.f32 %v1394_v10, %v38_v7  ;;  %vm149_vm4 = vcmask 23552   ;;  %vm446_vm5 = vcmp.lt.s32.totalorder %v1645_v28, 127 }
   0x9   :  { %v312_v62 = vcombine.high %v310_v42, %v310_v42  ;;  %v311_v1 = vcombine.high %v303_v52, %v303_v52  ;;  %v321_v7 = vsel %vm156_vm0, %v303_v52, 0  ;;  %vm313_vm7 = vcmask 15360  }
   0xa   :  { %v1602_v14 = vrot.slane %v49_v12, %v59_v9  ;;  %v1604_v15 = vrot.slane %v48_v13, %v59_v9  ;;  %v1606_v16 = vrot.slane %v49_v12, %v63_v11  ;;  %v1608_v17 = vrot.slane %v48_v13, %v63_v11 }
   0xb   :  { %vm939_vm8 = vcmask 261120   ;;  %vm1320_vm9 = vcmask 1042432   ;;  %vm1385_vm10 = vcmp.lt.s32.totalorder %v57_v0, 512 }
   0xc   :  { %v88_v18 = vrot.slane %v1602_v14, %v59_v9  ;;  %v80_v19 = vrot.slane %v1604_v15, %v59_v9  ;;  %v92_v20 = vrot.slane %v1606_v16, %v59_v9  ;;  %v84_v21 = vrot.slane %v1608_v17, %v59_v9 }
   0xd   :  { %v327_v9 = vsel %vm156_vm0, %v311_v1, 0 }
   0xe   :  { %103 = vrot.lane.b32.xlu1 %v88_v18, %s1544_s0  ;;  %95 = vrot.lane.b32.xlu0 %v80_v19, %s1544_s0 }
  0x12   :  { %107 = vrot.lane.b32.xlu1 %v92_v20, %s1544_s0  ;;  %99 = vrot.lane.b32.xlu0 %v84_v21, %s1544_s0 }
  0x16   :  { %453 = vrot.lane.b32.xlu1 %v1608_v17, %s1546_s28  ;;  %451 = vrot.lane.b32.xlu0 %v1604_v15, %s1546_s28 }
  0x1a   :  { %457 = vrot.lane.b32.xlu1 %v1606_v16, %s1546_s28  ;;  %455 = vrot.lane.b32.xlu0 %v1602_v14, %s1546_s28 }
  0x1e   :  { %440 = vrot.lane.b32.xlu1 %v1608_v17, %s1547_s29  ;;  %438 = vrot.lane.b32.xlu0 %v1604_v15, %s1547_s29 }
  0x22   :  { %444 = vrot.lane.b32.xlu1 %v1606_v16, %s1547_s29  ;;  %442 = vrot.lane.b32.xlu0 %v1602_v14, %s1547_s29 }
  0x26   :  { %658 = vrot.lane.b32.xlu0 %v80_v19, %s1548_s30  ;;  %662 = vrot.lane.b32.xlu1 %v84_v21, %s1548_s30  ;;  %v1717_v19 = vld [vmem:[%s2025_s3 + $0x10] sm:$0x77]  ;;  %v1724_v21 = vld [vmem:[%s2025_s3 + $0x18] sm:$0x77] }
  0x2a   :  { %666 = vrot.lane.b32.xlu0 %v88_v18, %s1548_s30  ;;  %670 = vrot.lane.b32.xlu1 %v92_v20, %s1548_s30 }
  0x80   :  { %v104_v31 = vpop.permute.xlu1 %103  ;;  %v96_v32 = vpop.permute.xlu0 %95 }
  0x84   :  { %v108_v38 = vpop.permute.xlu1 %107  ;;  %v100_v39 = vpop.permute.xlu0 %99 }
  0x85   :  { %v115_v43 = vsel %vm1661_vm1, %v104_v31, %v108_v38  ;;  %v118_v44 = vsel %vm1661_vm1, %v108_v38, %v96_v32  ;;  %v116_v45 = vsel %vm1661_vm1, %v100_v39, %v104_v31  ;;  %v117_v46 = vsel %vm1661_vm1, %v96_v32, %v100_v39 }
  0x86   :  { %v127_v47 = vmul.f32 %v1650_v29, %v118_v44  ;;  %v129_v48 = vmul.f32 %v1655_v30, %v116_v45  ;;  %v130_v49 = vmul.f32 %v1667_v36, %v115_v43  ;;  %v128_v50 = vmul.f32 %v1671_v37, %v117_v46 }
  0x87   :  { %v1736_v38 = vcombine.high %v1717_v19, %v1717_v19  ;;  %v672_v46 = vadd.s32 111, %v1598_v4 }
  0x88   :  { %v135_v53 = vpack.c.bf16 %v127_v47, %v127_v47  ;;  %v137_v54 = vpack.c.bf16 %v129_v48, %v129_v48  ;;  %v454_v55 = vpop.permute.xlu1 %453  ;;  %v452_v56 = vpop.permute.xlu0 %451  ;;  %v138_v57 = vpack.c.bf16 %v130_v49, %v130_v49  ;;  %v136_v58 = vpack.c.bf16 %v128_v50, %v128_v50  ;;  %v1759_v47 = vld [vmem:[%s2025_s3 + $0x20] sm:$0x77] }
  0x89   :  { %v462_v10 = vsel %vm459_vm3, %v452_v56, %v454_v55  ;;  %vm1781_vm6 = vcmp.lt.s32.totalorder %v1645_v28, %v672_v46 }
  0x8a   :  { %v170_v59 = vand.u32 %v1688_v51, %v138_v57  ;;  %v164_v60 = vand.u32 %v1688_v51, %v136_v58  ;;  %v161_v61 = vand.u32 %v1688_v51, %v135_v53  ;;  %v167_v63 = vand.u32 %v1688_v51, %v137_v54  ;;  %v1772_v53 = vld [vmem:[%s2025_s3 + $0x28] sm:$0x77] }
  0x8b   :  { %v469_v24 = vrot.slane %v462_v10, 6 }
  0x8c   :  { %225 = vmatprep.subr.bf16.mxu1 %v170_v59  ;;  %v458_v2 = vpop.permute.xlu1 %457  ;;  %172 = vmatprep.subr.bf16.mxu0 %v164_v60  ;;  %v456_v3 = vpop.permute.xlu0 %455  ;;  %v1787_v60 = vcombine.high %v1772_v53, %v1772_v53 }
  0x8d   :  { %v463_v6 = vsel %vm459_vm3, %v458_v2, %v452_v56  ;;  %173 = vmatpush1.bf16.msra.mxu0 %v161_v61  ;;  %226 = vmatpush1.bf16.msra.mxu1 %v167_v63  ;;  %v460_v11 = vsel %vm459_vm3, %v456_v3, %v458_v2  ;;  %v461_v12 = vsel %vm459_vm3, %v454_v55, %v456_v3  ;;  %v1504_v63 = vld [vmem:[%s2023_s1] sm:$0xff]  }
  0x8e   :  { %1405 = vmatprep.subr.msk.bf16.mxu0 %vm156_vm0, %v310_v42  ;;  %1408 = vmatprep.subr.msk.bf16.mxu1 %vm156_vm0, %v312_v62  ;;  %v468_v8 = vrot.slane %v463_v6, 6  ;;  %v470_v25 = vrot.slane %v461_v12, 6  ;;  %v471_v26 = vrot.slane %v460_v11, 6  ;;  %v1778_v55 = vcombine.high %v1759_v47, %v1759_v47 }
  0x90   :  { %v441_v13 = vpop.permute.xlu1 %440  ;;  %1398 = vmatmul.mubr.msk.bf16.vlgmr.msra.gmra.mrb[0].mxu0 %vm149_vm4, %v1500_v5  ;;  %1400 = vmatmul.mubr.msk.bf16.vlgmr.msra.gmra.mrb[0].mxu1 %vm149_vm4, %v1500_v5  ;;  %v439_v18 = vpop.permute.xlu0 %438 }
  0x91   :  { %v449_v20 = vsel %vm446_vm5, %v439_v18, %v441_v13  ;;  %333 = vmatpush1.bf16.msra.mxu0 %v321_v7  ;;  %214 = vmatprep.mubr.bf16.mxu0 %v1545_v22 }
  0x92   :  { %v476_v23 = vsel %vm156_vm0, %v449_v20, %v1604_v15  ;;  %267 = vmatprep.mubr.bf16.mxu1 %v1545_v22  ;;  %386 = vmatpush1.bf16.msra.mxu1 %v327_v9  ;;  %v1740_v15 = vcombine.high %v1724_v21, %v1724_v21 }
  0x93   :  { %v480_v27 = vsel %vm157_vm2, %v476_v23, %v468_v8  ;;  %v1507_v23 = vld [vmem:[%s2023_s1 + $0x8] sm:$0xff]  }
  0x94   :  { %v445_v31 = vpop.permute.xlu1 %444  ;;  %v443_v32 = vpop.permute.xlu0 %442  ;;  %v493_v39 = vmul.f32 %v1717_v19, %v480_v27 }
  0x95   :  { %v450_v40 = vsel %vm446_vm5, %v445_v31, %v439_v18  ;;  %v447_v41 = vsel %vm446_vm5, %v443_v32, %v445_v31  ;;  %v448_v42 = vsel %vm446_vm5, %v441_v13, %v443_v32  ;;  %v1508_v31 = vld [vmem:[%s2022_s4 + $0x10] sm:$0xff]  }
  0x96   :  { %v479_v43 = vsel %vm156_vm0, %v450_v40, %v1606_v16  ;;  %v477_v44 = vsel %vm156_vm0, %v448_v42, %v1608_v17  ;;  %v478_v45 = vsel %vm156_vm0, %v447_v41, %v1602_v14  ;;  %v502_v54 = vpack.c.bf16 %v493_v39, %v493_v39  ;;  %v1509_v39 = vld [vmem:[%s2022_s4 + $0x18] sm:$0xff]   ;;  %v1511_v40 = vld [vmem:[%s2022_s4 + $0x28] sm:$0xff]  }
  0x97   :  { %v483_v48 = vsel %vm157_vm2, %v479_v43, %v471_v26  ;;  %v481_v49 = vsel %vm157_vm2, %v477_v44, %v469_v24  ;;  %v482_v50 = vsel %vm157_vm2, %v478_v45, %v470_v25 }
  0x98   :  { %v495_v16 = vmul.f32 %v1724_v21, %v482_v50  ;;  %1399 = vmatmul.mubr.msk.bf16.gmra.mrb[4].mxu0 %vm149_vm4, %v1501_v33  ;;  %1401 = vmatmul.mubr.msk.bf16.gmra.mrb[4].mxu1 %vm149_vm4, %v1501_v33  ;;  %v494_v14 = vmul.f32 %v1736_v38, %v481_v49  ;;  %v496_v4 = vmul.f32 %v1740_v15, %v483_v48  ;;  %v659_v17 = vpop.permute.xlu0 %658  ;;  %v663_v52 = vpop.permute.xlu1 %662 }
  0x99   :  { %364 = vmatprep.mubr.bf16.mxu0 %v1545_v22  ;;  %417 = vmatprep.mubr.bf16.mxu1 %v1545_v22  ;;  %v523_v3 = vand.u32 %v502_v54, %v1688_v51  ;;  %v676_v12 = vsel %vm1781_vm6, %v659_v17, %v663_v52 }
  0x9a   :  { %v504_v56 = vpack.c.bf16 %v495_v16, %v495_v16  ;;  %v503_v57 = vpack.c.bf16 %v494_v14, %v494_v14  ;;  %v505_v58 = vpack.c.bf16 %v496_v4, %v496_v4  ;;  %v687_v24 = vmul.f32 %v1759_v47, %v676_v12 }
  0x9c   :  { %v526_v61 = vand.u32 %v503_v57, %v1688_v51  ;;  %v532_v62 = vand.u32 %v505_v58, %v1688_v51  ;;  %v667_v1 = vpop.permute.xlu0 %666  ;;  %v671_v2 = vpop.permute.xlu1 %670  ;;  %v529_v5 = vand.u32 %v504_v56, %v1688_v51  ;;  %v696_v26 = vpack.c.bf16 %v687_v24, %v687_v24 }
  0x9d   :  { %v675_v6 = vsel %vm1781_vm6, %v663_v52, %v667_v1  ;;  %v677_v7 = vsel %vm1781_vm6, %v671_v2, %v659_v17  ;;  %v674_v13 = vsel %vm1781_vm6, %v667_v1, %v671_v2 }
  0x9e   :  { %534 = vmatprep.subr.bf16.mxu0 %v526_v61  ;;  %587 = vmatprep.subr.bf16.mxu1 %v532_v62  ;;  %v688_v8 = vmul.f32 %v1778_v55, %v675_v6  ;;  %v690_v9 = vmul.f32 %v1787_v60, %v677_v7  ;;  %v689_v25 = vmul.f32 %v1772_v53, %v674_v13 }
  0x9f   :  { %v717_v32 = vand.u32 %v696_v26, %v1688_v51 }
  0xa0   :  { %1406 = vmatmul.mubr.msk.bf16.vlgmr.msra.gmra.mrb[0].mxu0 %vm313_vm7, %v1504_v63  ;;  %1409 = vmatmul.mubr.msk.bf16.vlgmr.msra.gmra.mrb[0].mxu1 %vm313_vm7, %v1504_v63  ;;  %v697_v10 = vpack.c.bf16 %v688_v8, %v688_v8  ;;  %v699_v11 = vpack.c.bf16 %v690_v9, %v690_v9  ;;  %v698_v27 = vpack.c.bf16 %v689_v25, %v689_v25 }
  0xa1   :  { %535 = vmatpush1.bf16.msra.mxu0 %v523_v3  ;;  %588 = vmatpush1.bf16.msra.mxu1 %v529_v5 }
  0xa2   :  { %374 = vmatprep.mubr.bf16.mxu0 %v1545_v22  ;;  %427 = vmatprep.mubr.bf16.mxu1 %v1545_v22  ;;  %v720_v18 = vand.u32 %v697_v10, %v1688_v51  ;;  %v726_v20 = vand.u32 %v699_v11, %v1688_v51  ;;  %v723_v33 = vand.u32 %v698_v27, %v1688_v51  ;;  %v1510_v51 = vld [vmem:[%s2022_s4 + $0x20] sm:$0xff]  }
  0xa4   :  { %728 = vmatprep.subr.bf16.mxu0 %v720_v18  ;;  %781 = vmatprep.subr.bf16.mxu1 %v726_v20 }
  0xa8   :  { %1407 = vmatmul.mubr.msk.bf16.gmra.mrb[4].mxu0 %vm313_vm7, %v1507_v23  ;;  %1410 = vmatmul.mubr.msk.bf16.gmra.mrb[4].mxu1 %vm313_vm7, %v1507_v23 }
  0xa9   :  { %566 = vmatprep.mubr.bf16.mxu0 %v1545_v22  ;;  %619 = vmatprep.mubr.bf16.mxu1 %v1545_v22 }
  0xb0   :  { %1419 = vmatmul.mubr.msk.bf16.vlgmr.msra.gmra.mrb[0].mxu0 %vm149_vm4, %v1508_v31  ;;  %1421 = vmatmul.mubr.msk.bf16.vlgmr.msra.gmra.mrb[0].mxu1 %vm149_vm4, %v1508_v31 }
  0xb1   :  { %729 = vmatpush1.bf16.msra.mxu0 %v717_v32  ;;  %782 = vmatpush1.bf16.msra.mxu1 %v723_v33 }
  0xb2   :  { %576 = vmatprep.mubr.bf16.mxu0 %v1545_v22  ;;  %629 = vmatprep.mubr.bf16.mxu1 %v1545_v22 }
  0xb8   :  { %1420 = vmatmul.mubr.msk.bf16.gmra.mrb[4].mxu0 %vm149_vm4, %v1509_v39  ;;  %1422 = vmatmul.mubr.msk.bf16.gmra.mrb[4].mxu1 %vm149_vm4, %v1509_v39 }
  0xb9   :  { %760 = vmatprep.mubr.bf16.mxu0 %v1545_v22  ;;  %813 = vmatprep.mubr.bf16.mxu1 %v1545_v22 }
  0xc0   :  { %1431 = vmatmul.mubr.msk.bf16.vlgmr.msra.gmra.mrb[0].mxu0 %vm149_vm4, %v1510_v51  ;;  %1433 = vmatmul.mubr.msk.bf16.vlgmr.msra.gmra.mrb[0].mxu1 %vm149_vm4, %v1510_v51 }
  0xc1   :  { %770 = vmatprep.mubr.bf16.mxu0 %v1545_v22  ;;  %823 = vmatprep.mubr.bf16.mxu1 %v1545_v22 }
  0xc8   :  { %1432 = vmatmul.mubr.msk.bf16.gmra.mrb[4].mxu0 %vm149_vm4, %v1511_v40  ;;  %1434 = vmatmul.mubr.msk.bf16.gmra.mrb[4].mxu1 %vm149_vm4, %v1511_v40 }
  0xc9   :  { %975 = vmatprep.mubr.bf16.mxu0 %v1545_v22  ;;  %1016 = vmatprep.mubr.bf16.mxu1 %v1545_v22 }
 0x193   :  { %v1851_v41 = vpop.f32.mrb[0].mxu0  ;;  %v1853_v42 = vpop.f32.mrb[0].mxu1 }
 0x194   :  { %v850_v43 = vmul.f32 0.5, %v1851_v41  ;;  %v852_v44 = vmul.f32 0.5, %v1853_v42  ;;  %v1857_v45 = vpop.f32.mrb[1].mxu0  ;;  %v1859_v46 = vpop.f32.mrb[1].mxu1 }
 0x195   :  { %v851_v48 = vmul.f32 0.5, %v1857_v45  ;;  %v853_v49 = vmul.f32 0.5, %v1859_v46  ;;  %v1863_v50 = vpop.f32.mrb[2].mxu0  ;;  %v1865_v16 = vpop.f32.mrb[2].mxu1 }
 0x196   :  { %1512 = vtanh.f32 %v850_v43  ;;  %v854_v14 = vmul.f32 0.5, %v1863_v50  ;;  %v1868_v4 = vpop.f32.mrb[3].mxu0  ;;  %v1870_v17 = vpop.f32.mrb[3].mxu1  ;;  %v856_v52 = vmul.f32 0.5, %v1865_v16 }
 0x197   :  { %1514 = vtanh.f32 %v852_v44  ;;  %v855_v54 = vmul.f32 0.5, %v1868_v4  ;;  %v857_v56 = vmul.f32 0.5, %v1870_v17 }
 0x198   :  { %1516 = vtanh.f32 %v851_v48 }
 0x199   :  { %1518 = vtanh.f32 %v853_v49 }
 0x19a   :  { %1520 = vtanh.f32 %v854_v14 }
 0x19b   :  { %1522 = vtanh.f32 %v856_v52  ;;  %v1875_v57 = vpop.f32.mrb[4].mxu0  ;;  %v1877_v58 = vpop.f32.mrb[4].mxu1 }
 0x19c   :  { %1524 = vtanh.f32 %v855_v54  ;;  %v858_v61 = vmul.f32 0.5, %v1875_v57  ;;  %v860_v62 = vmul.f32 0.5, %v1877_v58  ;;  %v1881_v63 = vpop.f32.mrb[5].mxu0  ;;  %v1883_v1 = vpop.f32.mrb[5].mxu1 }
 0x19d   :  { %1526 = vtanh.f32 %v857_v56  ;;  %v859_v2 = vmul.f32 0.5, %v1881_v63  ;;  %v861_v3 = vmul.f32 0.5, %v1883_v1  ;;  %v1887_v5 = vpop.f32.mrb[6].mxu0  ;;  %v1889_v6 = vpop.f32.mrb[6].mxu1 }
 0x19e   :  { %1528 = vtanh.f32 %v858_v61  ;;  %v862_v7 = vmul.f32 0.5, %v1887_v5  ;;  %v1892_v8 = vpop.f32.mrb[7].mxu0  ;;  %v1894_v9 = vpop.f32.mrb[7].mxu1  ;;  %v864_v10 = vmul.f32 0.5, %v1889_v6 }
 0x19f   :  { %1530 = vtanh.f32 %v860_v62  ;;  %v863_v12 = vmul.f32 0.5, %v1892_v8  ;;  %v865_v20 = vmul.f32 0.5, %v1894_v9 }
 0x1a0   :  { %v1513_v11 = vpop.eup %1512  ;;  %1532 = vtanh.f32 %v859_v2 }
 0x1a1   :  { %v1515_v13 = vpop.eup %1514  ;;  %v882_v18 = vmul.f32 0.5, %v1513_v11  ;;  %1534 = vtanh.f32 %v861_v3 }
 0x1a2   :  { %v1517_v23 = vpop.eup %1516  ;;  %v884_v24 = vmul.f32 0.5, %v1515_v13  ;;  %1536 = vtanh.f32 %v862_v7 }
 0x1a3   :  { %v1519_v25 = vpop.eup %1518  ;;  %v883_v26 = vmul.f32 0.5, %v1517_v23  ;;  %1538 = vtanh.f32 %v864_v10  ;;  %v898_v33 = vadd.f32 0.5, %v882_v18 }
 0x1a4   :  { %v1521_v27 = vpop.eup %1520  ;;  %v885_v31 = vmul.f32 0.5, %v1519_v25  ;;  %1540 = vtanh.f32 %v863_v12  ;;  %v900_v40 = vadd.f32 0.5, %v884_v24 }
 0x1a5   :  { %v1523_v32 = vpop.eup %1522  ;;  %v886_v39 = vmul.f32 0.5, %v1521_v27  ;;  %1542 = vtanh.f32 %v865_v20  ;;  %v899_v48 = vadd.f32 0.5, %v883_v26  ;;  %v914_v2 = vmul.f32 %v898_v33, %v1851_v41 }
 0x1a6   :  { %v1525_v51 = vpop.eup %1524  ;;  %v888_v43 = vmul.f32 0.5, %v1523_v32  ;;  %v901_v54 = vadd.f32 0.5, %v885_v31  ;;  %v916_v12 = vmul.f32 %v900_v40, %v1853_v42 }
 0x1a7   :  { %v1527_v44 = vpop.eup %1526  ;;  %v902_v49 = vadd.f32 0.5, %v886_v39  ;;  %v887_v14 = vmul.f32 0.5, %v1525_v51  ;;  %v915_v24 = vmul.f32 %v899_v48, %v1857_v45 }
 0x1a8   :  { %v1529_v52 = vpop.eup %1528  ;;  %v904_v56 = vadd.f32 0.5, %v888_v43  ;;  %v889_v61 = vmul.f32 0.5, %v1527_v44 }
 0x1a9   :  { %v1531_v62 = vpop.eup %1530  ;;  %v918_v3 = vmul.f32 %v902_v49, %v1863_v50  ;;  %v903_v7 = vadd.f32 0.5, %v887_v14  ;;  %v890_v10 = vmul.f32 0.5, %v1529_v52  ;;  %v917_v50 = vmul.f32 %v901_v54, %v1859_v46 }
 0x1aa   :  { %v1533_v11 = vpop.eup %1532  ;;  %v920_v13 = vmul.f32 %v904_v56, %v1865_v16  ;;  %v905_v18 = vadd.f32 0.5, %v889_v61  ;;  %v892_v20 = vmul.f32 0.5, %v1531_v62 }
 0x1ab   :  { %v1535_v23 = vpop.eup %1534  ;;  %v1904_v25 = vpack.c.bf16 %v918_v3, %v914_v2  ;;  %v919_v26 = vmul.f32 %v903_v7, %v1868_v4  ;;  %v891_v27 = vmul.f32 0.5, %v1533_v11  ;;  %v906_v16 = vadd.f32 0.5, %v890_v10 }
 0x1ac   :  { %v1537_v41 = vpop.eup %1536  ;;  %v932_v31 = vpack.c.bf16 %v920_v13, %v916_v12  ;;  %v921_v32 = vmul.f32 %v905_v18, %v1870_v17  ;;  %v893_v33 = vmul.f32 0.5, %v1535_v23  ;;  %v908_v44 = vadd.f32 0.5, %v892_v20 }
 0x1ad   :  { %v1539_v42 = vpop.eup %1538  ;;  %v931_v39 = vpack.c.bf16 %v919_v26, %v915_v24  ;;  %v894_v51 = vmul.f32 0.5, %v1537_v41  ;;  %v907_v49 = vadd.f32 0.5, %v891_v27  ;;  %v922_v17 = vmul.f32 %v906_v16, %v1875_v57 }
 0x1ae   :  { %v1541_v40 = vpop.eup %1540  ;;  %v933_v43 = vpack.c.bf16 %v921_v32, %v917_v50  ;;  %v896_v45 = vmul.f32 0.5, %v1539_v42  ;;  %v909_v52 = vadd.f32 0.5, %v893_v33  ;;  %v924_v62 = vmul.f32 %v908_v44, %v1877_v58  ;;  %v938_v58 = vld [vmem:[%s2026_s5] sm:$0x3] }
 0x1af   :  { %v1543_v48 = vpop.eup %1542  ;;  %v910_v14 = vadd.f32 0.5, %v894_v51  ;;  %v895_v4 = vmul.f32 0.5, %v1541_v40  ;;  %943 = vmatprep.subr.bf16.mxu0 %v931_v39  ;;  %v923_v7 = vmul.f32 %v907_v49, %v1881_v63  ;;  %v1437_v63 = vld [vmem:[%s2026_s5 + $0x2] sm:$0x3] }
 0x1b0   :  { %v912_v56 = vadd.f32 0.5, %v896_v45  ;;  %v897_v46 = vmul.f32 0.5, %v1543_v48  ;;  %984 = vmatprep.subr.bf16.mxu1 %v933_v43  ;;  %944 = vmatpush1.bf16.msra.mxu0 %v1904_v25  ;;  %v925_v12 = vmul.f32 %v909_v52, %v1883_v1  ;;  %v1440_v1 = vld [vmem:[%s2026_s5 + $0x4] sm:$0x3] }
 0x1b1   :  { %v926_v54 = vmul.f32 %v910_v14, %v1887_v5  ;;  %v911_v61 = vadd.f32 0.5, %v895_v4  ;;  %985 = vmatpush1.bf16.msra.mxu1 %v932_v31 }
 0x1b2   :  { %v928_v2 = vmul.f32 %v912_v56, %v1889_v6  ;;  %v913_v3 = vadd.f32 0.5, %v897_v46 }
 0x1b3   :  { %v934_v10 = vpack.c.bf16 %v926_v54, %v922_v17  ;;  %v927_v11 = vmul.f32 %v911_v61, %v1892_v8 }
 0x1b4   :  { %v936_v13 = vpack.c.bf16 %v928_v2, %v924_v62  ;;  %v929_v18 = vmul.f32 %v913_v3, %v1894_v9 }
 0x1b5   :  { %v935_v57 = vpack.c.bf16 %v927_v11, %v923_v7 }
 0x1b6   :  { %v937_v20 = vpack.c.bf16 %v929_v18, %v925_v12 }
 0x1b7   :  { %945 = vmatprep.subr.bf16.mxu0 %v935_v57 }
 0x1b8   :  { %986 = vmatprep.subr.bf16.mxu1 %v937_v20  ;;  %946 = vmatpush1.bf16.msra.mxu0 %v934_v10 }
 0x1b9   :  { %987 = vmatpush1.bf16.msra.mxu1 %v936_v13  ;;  %1058 = vmatprep.subr.bf16.mxu0 %v931_v39 }
 0x1ba   :  { %1099 = vmatprep.subr.bf16.mxu1 %v933_v43 }
 0x1bb   :  { %1435 = vmatmul.mubr.msk.bf16.vlgmr.msra.gmra.mrb[8].mxu0 %vm939_vm8, %v938_v58 }
 0x1bc   :  { %1436 = vmatmul.mubr.msk.bf16.vlgmr.msra.gmra.mrb[8].mxu1 %vm939_vm8, %v938_v58  ;;  %1059 = vmatpush1.bf16.msra.mxu0 %v1904_v25 }
 0x1bd   :  { %1100 = vmatpush1.bf16.msra.mxu1 %v932_v31  ;;  %1060 = vmatprep.subr.bf16.mxu0 %v935_v57 }
 0x1be   :  { %1101 = vmatprep.subr.bf16.mxu1 %v937_v20  ;;  %1090 = vmatprep.mubr.bf16.mxu0 %v1545_v22 }
 0x1bf   :  { %1131 = vmatprep.mubr.bf16.mxu1 %v1545_v22 }
 0x1c0   :  { %1061 = vmatpush1.bf16.msra.mxu0 %v934_v10 }
 0x1c1   :  { %1102 = vmatpush1.bf16.msra.mxu1 %v936_v13  ;;  %1209 = vmatprep.subr.bf16.mxu0 %v931_v39 }
 0x1c2   :  { %1250 = vmatprep.subr.bf16.mxu1 %v933_v43 }
 0x1c3   :  { %1438 = vmatmul.mubr.msk.bf16.vlgmr.msra.gmra.mrb[12].mxu0 %vm939_vm8, %v1437_v63 }
 0x1c4   :  { %1439 = vmatmul.mubr.msk.bf16.vlgmr.msra.gmra.mrb[12].mxu1 %vm939_vm8, %v1437_v63  ;;  %1210 = vmatpush1.bf16.msra.mxu0 %v1904_v25 }
 0x1c5   :  { %1251 = vmatpush1.bf16.msra.mxu1 %v932_v31  ;;  %1211 = vmatprep.subr.bf16.mxu0 %v935_v57 }
 0x1c6   :  { %1252 = vmatprep.subr.bf16.mxu1 %v937_v20  ;;  %1241 = vmatprep.mubr.bf16.mxu0 %v1545_v22 }
 0x1c7   :  { %1282 = vmatprep.mubr.bf16.mxu1 %v1545_v22 }
 0x1c8   :  { %1212 = vmatpush1.bf16.msra.mxu0 %v934_v10 }
 0x1c9   :  { %1253 = vmatpush1.bf16.msra.mxu1 %v936_v13 }
 0x1cb   :  { %1441 = vmatmul.mubr.msk.bf16.vlgmr.msra.gmra.mrb[16].mxu0 %vm939_vm8, %v1440_v1 }
 0x1cc   :  { %1442 = vmatmul.mubr.msk.bf16.vlgmr.msra.gmra.mrb[16].mxu1 %vm939_vm8, %v1440_v1 }
 0x28e   :  { %v977_v5 = vpop.f32.mrb[8].mxu0 }
 0x28f   :  { %1027 = vrot.lane.b32.xlu0 %v977_v5, %s1544_s0  ;;  %v979_v6 = vpop.f32.mrb[9].mxu0  ;;  %v1018_v8 = vpop.f32.mrb[8].mxu1 }
 0x290   :  { %1031 = vrot.lane.b32.xlu1 %v979_v6, %s1544_s0  ;;  %v981_v9 = vpop.f32.mrb[10].mxu0  ;;  %v1020_v23 = vpop.f32.mrb[9].mxu1 }
 0x291   :  { %v982_v22 = vpop.f32.mrb[11].mxu0  ;;  %v1022_v24 = vpop.f32.mrb[10].mxu1 }
 0x292   :  { %v1023_v25 = vpop.f32.mrb[11].mxu1 }
 0x293   :  { %1035 = vrot.lane.b32.xlu0 %v1018_v8, %s1544_s0 }
 0x294   :  { %1039 = vrot.lane.b32.xlu1 %v1020_v23, %s1544_s0 }
 0x296   :  { %v1092_v26 = vpop.f32.mrb[12].mxu0 }
 0x297   :  { %v1094_v27 = vpop.f32.mrb[13].mxu0  ;;  %1140 = vrot.lane.b32.xlu0 %v1092_v26, %s1547_s29  ;;  %v1133_v41 = vpop.f32.mrb[12].mxu1  ;;  %v1156_v39 = vrot.slane %v1092_v26, 2 }
 0x298   :  { %1142 = vrot.lane.b32.xlu1 %v1094_v27, %s1547_s29  ;;  %v1096_v50 = vpop.f32.mrb[14].mxu0  ;;  %v1135_v31 = vpop.f32.mrb[13].mxu1  ;;  %v1157_v16 = vrot.slane %v1094_v27, 2  ;;  %v1158_v48 = vrot.slane %v1133_v41, 2 }
 0x299   :  { %v1097_v32 = vpop.f32.mrb[15].mxu0  ;;  %v1137_v33 = vpop.f32.mrb[14].mxu1  ;;  %v1159_v4 = vrot.slane %v1135_v31, 2 }
 0x29a   :  { %v1138_v42 = vpop.f32.mrb[15].mxu1 }
 0x29b   :  { %1144 = vrot.lane.b32.xlu0 %v1133_v41, %s1547_s29 }
 0x29c   :  { %1146 = vrot.lane.b32.xlu1 %v1135_v31, %s1547_s29 }
 0x29e   :  { %v1243_v51 = vpop.f32.mrb[16].mxu0 }
 0x29f   :  { %1164 = vrot.lane.b32.xlu0 %v1156_v39, %s1546_s28  ;;  %v1245_v40 = vpop.f32.mrb[17].mxu0  ;;  %v1284_v43 = vpop.f32.mrb[16].mxu1 }
 0x2a0   :  { %1166 = vrot.lane.b32.xlu1 %v1157_v16, %s1546_s28  ;;  %v1247_v44 = vpop.f32.mrb[18].mxu0  ;;  %v1286_v45 = vpop.f32.mrb[17].mxu1 }
 0x2a1   :  { %v1248_v49 = vpop.f32.mrb[19].mxu0  ;;  %v1288_v14 = vpop.f32.mrb[18].mxu1 }
 0x2a2   :  { %v1289_v52 = vpop.f32.mrb[19].mxu1 }
 0x2a3   :  { %1168 = vrot.lane.b32.xlu0 %v1158_v48, %s1546_s28 }
 0x2a4   :  { %1170 = vrot.lane.b32.xlu1 %v1159_v4, %s1546_s28 }
 0x2a7   :  { %1293 = vrot.lane.b32.xlu0 %v1243_v51, %s1548_s30 }
 0x2a8   :  { %1297 = vrot.lane.b32.xlu1 %v1245_v40, %s1548_s30 }
 0x2ab   :  { %1301 = vrot.lane.b32.xlu0 %v1284_v43, %s1548_s30 }
 0x2ac   :  { %1305 = vrot.lane.b32.xlu1 %v1286_v45, %s1548_s30 }
 0x301   :  { %v1028_v56 = vpop.permute.xlu0 %1027 }
 0x302   :  { %v1032_v46 = vpop.permute.xlu1 %1031 }
 0x303   :  { %v1043_v50 = vsel %vm1661_vm1, %v1028_v56, %v1032_v46 }
 0x304   :  { %v1046_v45 = vmul.f32 %v1043_v50, %v1671_v37 }
 0x305   :  { %v1036_v17 = vpop.permute.xlu0 %1035 }
 0x306   :  { %v1040_v54 = vpop.permute.xlu1 %1039  ;;  %v1042_v28 = vsel %vm1661_vm1, %v1032_v46, %v1036_v17 }
 0x307   :  { %v1044_v22 = vsel %vm1661_vm1, %v1040_v54, %v1028_v56  ;;  %v1041_v43 = vsel %vm1661_vm1, %v1036_v17, %v1040_v54  ;;  %v1047_v35 = vmul.f32 %v1042_v28, %v1655_v30 }
 0x309   :  { %v1141_v61 = vpop.permute.xlu0 %1140 }
 0x30a   :  { %v1143_v62 = vpop.permute.xlu1 %1142 }
 0x30b   :  { %v1150_v20 = vsel %vm446_vm5, %v1141_v61, %v1143_v62 }
 0x30c   :  { %v1188_v32 = vsel %vm156_vm0, %v1150_v20, %v1092_v26  ;;  %v1045_v26 = vmul.f32 %v1044_v22, %v1650_v29  ;;  %v1048_v29 = vmul.f32 %v1041_v43, %v1667_v36 }
 0x30d   :  { %v1145_v2 = vpop.permute.xlu0 %1144 }
 0x30e   :  { %v1147_v3 = vpop.permute.xlu1 %1146  ;;  %v1149_v11 = vsel %vm446_vm5, %v1143_v62, %v1145_v2 }
 0x30f   :  { %v1148_v18 = vsel %vm446_vm5, %v1145_v2, %v1147_v3  ;;  %v1189_v58 = vsel %vm156_vm0, %v1149_v11, %v1094_v27  ;;  %v1151_v63 = vsel %vm446_vm5, %v1147_v3, %v1141_v61 }
 0x310   :  { %v1190_v24 = vsel %vm156_vm0, %v1148_v18, %v1133_v41  ;;  %v1191_v33 = vsel %vm156_vm0, %v1151_v63, %v1135_v31 }
 0x311   :  { %v1165_v7 = vpop.permute.xlu0 %1164 }
 0x312   :  { %v1167_v10 = vpop.permute.xlu1 %1166 }
 0x313   :  { %v1174_v12 = vsel %vm459_vm3, %v1165_v7, %v1167_v10 }
 0x314   :  { %v1181_v13 = vrot.slane %v1174_v12, 6 }
 0x315   :  { %v1169_v57 = vpop.permute.xlu0 %1168 }
 0x316   :  { %v1173_v1 = vsel %vm459_vm3, %v1167_v10, %v1169_v57  ;;  %v1171_v5 = vpop.permute.xlu1 %1170  ;;  %v1193_v6 = vsel %vm157_vm2, %v1189_v58, %v1181_v13 }
 0x317   :  { %v1182_v8 = vrot.slane %v1173_v1, 6  ;;  %v1172_v9 = vsel %vm459_vm3, %v1169_v57, %v1171_v5  ;;  %v1175_v23 = vsel %vm459_vm3, %v1171_v5, %v1165_v7  ;;  %v1197_v16 = vmul.f32 %v1193_v6, %v1736_v38 }
 0x318   :  { %v1180_v25 = vrot.slane %v1175_v23, 6  ;;  %v1183_v27 = vrot.slane %v1172_v9, 6 }
 0x319   :  { %v1194_v42 = vsel %vm157_vm2, %v1190_v24, %v1182_v8  ;;  %v1294_v39 = vpop.permute.xlu0 %1293  ;;  %v1201_v52 = vadd.f32 %v1197_v16, %v1046_v45  ;;  %v1349_v24 = vstv %s2027_s6 }
 0x31a   :  { %v1192_v51 = vsel %vm157_vm2, %v1188_v32, %v1180_v25  ;;  %v1195_v41 = vsel %vm157_vm2, %v1191_v33, %v1183_v27  ;;  %v1298_v40 = vpop.permute.xlu1 %1297  ;;  %v1198_v48 = vmul.f32 %v1724_v21, %v1194_v42 }
 0x31b   :  { %v1196_v31 = vmul.f32 %v1717_v19, %v1192_v51  ;;  %v1309_v44 = vsel %vm1781_vm6, %v1294_v39, %v1298_v40  ;;  %v1199_v38 = vmul.f32 %v1195_v41, %v1740_v15 }
 0x31c   :  { %v1311_v49 = vmul.f32 %v1759_v47, %v1309_v44  ;;  %v1202_v47 = vadd.f32 %v1198_v48, %v1047_v35 }
 0x31d   :  { %v1200_v14 = vadd.f32 %v1196_v31, %v1045_v26  ;;  %v1302_v4 = vpop.permute.xlu0 %1301  ;;  %v1203_v17 = vadd.f32 %v1199_v38, %v1048_v29 }
 0x31e   :  { %v1308_v19 = vsel %vm1781_vm6, %v1298_v40, %v1302_v4  ;;  %v1306_v56 = vpop.permute.xlu1 %1305 }
 0x31f   :  { %v1315_v46 = vadd.f32 %v1311_v49, %v1200_v14  ;;  %v1312_v37 = vmul.f32 %v1308_v19, %v1778_v55  ;;  %v1307_v21 = vsel %vm1781_vm6, %v1302_v4, %v1306_v56  ;;  %v1310_v15 = vsel %vm1781_vm6, %v1306_v56, %v1294_v39 }
 0x320   :  { %v1313_v30 = vmul.f32 %v1772_v53, %v1307_v21  ;;  %v1314_v36 = vmul.f32 %v1310_v15, %v1787_v60 }
 0x321   :  { %v1321_v54 = vsel %vm1320_vm9, %v1315_v46, 0.0  ;;  %v1316_v61 = vadd.f32 %v1312_v37, %v1201_v52 }
 0x322   :  { %v1322_v62 = vrot.slane %v1321_v54, 4  ;;  %v1317_v2 = vadd.f32 %v1313_v30, %v1202_v47  ;;  %v1318_v3 = vadd.f32 %v1314_v36, %v1203_v17 }
 0x323   :  { %v1328_v55 = vsel %vm1320_vm9, %v1316_v61, 0.0 }
 0x324   :  { %v1323_v7 = vadd.f32 %v1322_v62, %v1321_v54  ;;  %v1329_v10 = vrot.slane %v1328_v55, 4  ;;  %v1335_v11 = vsel %vm1320_vm9, %v1317_v2, 0.0  ;;  %v1342_v59 = vsel %vm1320_vm9, %v1318_v3, 0.0 }
 0x325   :  { %v1336_v12 = vrot.slane %v1335_v11, 4  ;;  %v1343_v13 = vrot.slane %v1342_v59, 4 }
 0x326   :  { %v1324_v18 = vrot.slane %v1323_v7, 2  ;;  %v1330_v53 = vadd.f32 %v1329_v10, %v1328_v55 }
 0x327   :  { %v1337_v57 = vadd.f32 %v1336_v12, %v1335_v11  ;;  %v1344_v60 = vadd.f32 %v1343_v13, %v1342_v59 }
 0x328   :  { %v1325_v20 = vadd.f32 %v1324_v18, %v1323_v7  ;;  %v1331_v58 = vrot.slane %v1330_v53, 2 }
 0x329   :  { %v1338_v63 = vrot.slane %v1337_v57, 2  ;;  %v1345_v1 = vrot.slane %v1344_v60, 2 }
 0x32a   :  { %v1326_v5 = vrot.slane %v1325_v20, 1  ;;  %v1332_v6 = vadd.f32 %v1331_v58, %v1330_v53 }
 0x32b   :  { %v1339_v8 = vadd.f32 %v1338_v63, %v1337_v57  ;;  %v1346_v9 = vadd.f32 %v1345_v1, %v1344_v60 }
 0x32c   :  { %v1327_v23 = vadd.f32 %v1326_v5, %v1325_v20  ;;  %v1333_v22 = vrot.slane %v1332_v6, 1 }
 0x32d   :  { %v1340_v25 = vrot.slane %v1339_v8, 1  ;;  %v1347_v27 = vrot.slane %v1346_v9, 1 }
 0x32e   :  { %v1334_v50 = vadd.f32 %v1333_v22, %v1332_v6  ;;  %v1350_v42 = vadd.f32 %v1349_v24, %v1327_v23 }
 0x32f   :  { %v1341_v32 = vadd.f32 %v1340_v25, %v1339_v8  ;;  %v1348_v33 = vadd.f32 %v1347_v27, %v1346_v9 }
 0x330   :  { %v1351_v39 = vadd.f32 %v1349_v24, %v1334_v50 }
 0x331   :  { %v1352_v28 = vadd.f32 %v1349_v24, %v1341_v32  ;;  %v1353_v16 = vadd.f32 %v1349_v24, %v1348_v33 }
 0x332   :  { %v1358_v51 = vcombine.low %v1350_v42, %v1351_v39 }
 0x333   :  { %v1359_v41 = vcombine.low %v1352_v28, %v1353_v16 }
 0x334   :  { %v1366_v40 = vrot.slane %v1358_v51, %v1658_v34 }
 0x335   :  { %v1373_v43 = vrot.slane %v1359_v41, %v1658_v34 }
 0x337   :  { %v1374_v26 = vcombine.low %v1366_v40, %v1373_v43 }
 0x339   :  { %v1381_v31 = vrot.slane %v1374_v26, %v1658_v34 }
 0x33b   :  { %1387 = vst.msk [vmem:[%s2028_s7] sm:$0xf] %vm1385_vm10, %v1381_v31 }

</bundles_post_ra>
